<compile_context>
chip_gen: v5e
topology: v5e:2x2
jax: 0.10.0
libtpu: 0.0.40
codegen_flags: <defaults>
</compile_context>

<pallas_src>
import jax
import jax.numpy as jnp
from jax import lax
from jax.experimental import pallas as pl
from jax.experimental.pallas import tpu as pltpu


def _graph_classifier_kernel(batch_ref, x_ref, w_ref, o_ref, sums_ref, counts_ref):
    step = pl.program_id(0)
    B = sums_ref.shape[0]          # padded number of graphs
    TILE_N = x_ref.shape[0]        # node tile size

    @pl.when(step == 0)
    def _():
        sums_ref[...] = jnp.zeros_like(sums_ref)
        counts_ref[...] = jnp.zeros_like(counts_ref)

    # One-hot [B, TILE_N] built in x's dtype (values 0/1 exact in any float).
    b_ids = batch_ref[0, :]                                        # [TILE_N] int32
    graph_iota = lax.broadcasted_iota(jnp.int32, (B, TILE_N), 0)   # [B, TILE_N]
    onehot = (graph_iota == b_ids[None, :]).astype(x_ref.dtype)

    # Segment-sum of this tile via MXU: [B, TILE_N] @ [TILE_N, F] -> [B, F].
    sums_ref[...] += jnp.dot(onehot, x_ref[...],
                             preferred_element_type=jnp.float32)
    # Per-graph node counts (f32 accumulation).
    counts_ref[...] += jnp.sum(onehot.astype(jnp.float32), axis=-1, keepdims=True)

    @pl.when(step == pl.num_programs(0) - 1)
    def _():
        # Classifier head on raw sums; divide by counts afterwards
        # (B x C elements instead of B x F).
        logits = jnp.dot(sums_ref[...], w_ref[...],
                         preferred_element_type=jnp.float32)       # [B, C_pad]
        inv = 1.0 / jnp.maximum(counts_ref[...], 1.0)              # [B, 1] exact
        o_ref[...] = (logits * inv).astype(o_ref.dtype)


def _round_up(v, m):
    return (v + m - 1) // m * m


def graph_classifier_forward(x, batch, weight_t, num_graphs):
    """x: [N, F] float, batch: [N] int32 graph ids, weight_t: [F, C] (= torch W.T)."""
    N, F = x.shape
    C = weight_t.shape[1]

    # Lane-dense padding: F, C -> multiples of 128; B -> multiple of 8.
    F_pad = _round_up(F, 128)
    C_pad = _round_up(C, 128)
    B_pad = _round_up(num_graphs, 8)

    # Node tiling: big tiles amortize per-grid-step overhead.
    TILE_N = 512 if N >= 512 else _round_up(N, 8)
    N_pad = _round_up(N, TILE_N)
    n_steps = N_pad // TILE_N

    x_p = jnp.zeros((N_pad, F_pad), x.dtype).at[:N, :F].set(x)
    # Sentinel id == B_pad so padded rows match no graph row of the one-hot.
    batch_p = (jnp.full((1, N_pad), B_pad, dtype=jnp.int32)
               .at[0, :N].set(batch.astype(jnp.int32)))
    w_p = jnp.zeros((F_pad, C_pad), weight_t.dtype).at[:F, :C].set(weight_t)

    x_itemsize = jnp.dtype(x.dtype).itemsize
    w_itemsize = jnp.dtype(weight_t.dtype).itemsize

    # Rough VMEM budget (double-buffered x/batch tiles + weight + output +
    # scratch accumulators), kept below v7x's 64 MiB physical VMEM.
    vmem_needed = (2 * (TILE_N * F_pad * x_itemsize + TILE_N * 4)
                   + 2 * F_pad * C_pad * w_itemsize
                   + 2 * B_pad * C_pad * 4
                   + B_pad * F_pad * 4
                   + B_pad * 4)
    vmem_limit = int(min(48 * 1024 * 1024,
                         max(2 * vmem_needed, 16 * 1024 * 1024)))

    cost = pl.CostEstimate(
        flops=2 * B_pad * N_pad * F_pad + 2 * B_pad * F_pad * C_pad,
        transcendentals=0,
        bytes_accessed=(N_pad * F_pad * x_itemsize
                        + F_pad * C_pad * w_itemsize
                        + N_pad * 4
                        + B_pad * C_pad * 4),
    )

    out_padded = pl.pallas_call(
        _graph_classifier_kernel,
        out_shape=jax.ShapeDtypeStruct((B_pad, C_pad), jnp.float32),
        grid_spec=pltpu.PrefetchScalarGridSpec(
            num_scalar_prefetch=0,
            grid=(n_steps,),
            in_specs=[
                pl.BlockSpec((1, TILE_N), lambda n: (0, n)),       # batch ids
                pl.BlockSpec((TILE_N, F_pad), lambda n: (n, 0)),   # node features
                pl.BlockSpec((F_pad, C_pad), lambda n: (0, 0)),    # linear weight^T
            ],
            out_specs=pl.BlockSpec((B_pad, C_pad), lambda n: (0, 0)),
            scratch_shapes=[
                pltpu.VMEM((B_pad, F_pad), jnp.float32),   # segment sums
                pltpu.VMEM((B_pad, 1), jnp.float32),       # per-graph counts
            ],
        ),
        compiler_params=pltpu.CompilerParams(
            dimension_semantics=("arbitrary",),
            vmem_limit_bytes=vmem_limit,
        ),
        cost_estimate=cost,
    )(batch_p, x_p, w_p)

    return out_padded[:num_graphs, :C]


def reference_forward(x, batch, weight_t, num_graphs):
    # pure-JAX reference: global_mean_pool + linear (no bias)
    sums = jax.ops.segment_sum(x, batch, num_segments=num_graphs)
    counts = jax.ops.segment_sum(jnp.ones((x.shape[0],), x.dtype), batch,
                                 num_segments=num_graphs)
    mean = sums / jnp.maximum(counts, 1.0)[:, None]
    return mean @ weight_t


if __name__ == "__main__":
    key = jax.random.PRNGKey(0)
    # nodes, input_dim, num_graphs, num_classes (N > TILE_N boundary to
    # exercise tiling + tail padding)
    N, F, B, C = 600, 32, 4, 8

    k_x, k_w, k_b = jax.random.split(key, 3)
    x = jax.random.normal(k_x, (N, F), dtype=jnp.float32)
    # deterministic graph assignment (non-uniform graph sizes)
    batch = jnp.sort(jax.random.randint(k_b, (N,), 0, B)).astype(jnp.int32)
    # torch nn.Linear(input_dim, num_classes, bias=False): weight [C, F]
    w = jax.random.normal(k_w, (C, F), dtype=jnp.float32) * (1.0 / jnp.sqrt(F))
    weight_t = w.T                      # [F, C]

    out = graph_classifier_forward(x, batch, weight_t, B)
    out = jax.block_until_ready(out)

    ref = reference_forward(x, batch, weight_t, B)
    assert out.shape == (B, C)
    assert jnp.allclose(out, ref, atol=1e-4, rtol=1e-4)

    print("KERNEL_OK")
</pallas_src>

<mosaic_0001>
module attributes {stable_mosaic.version = 11 : i64} {
  func.func @_graph_classifier_kernel(%arg0: i32, %arg1: memref<1x512xi32, #tpu.memory_space<vmem>>, %arg2: memref<512x128xf32, #tpu.memory_space<vmem>>, %arg3: memref<128x128xf32, #tpu.memory_space<vmem>>, %arg4: memref<8x128xf32, #tpu.memory_space<vmem>>, %arg5: memref<8x128xf32, #tpu.memory_space<vmem>>, %arg6: memref<8x1xf32, #tpu.memory_space<vmem>>) attributes {dimension_semantics = [#tpu.dimension_semantics<arbitrary>], iteration_bounds = array<i64: 2>, scalar_prefetch = 0 : i64, scratch_operands = 2 : i64, tpu.core_type = #tpu.core_type<tc>, window_params = [{transform_indices = @transform_0, window_bounds = array<i64: 1, 512>}, {transform_indices = @transform_1, window_bounds = array<i64: 512, 128>}, {pipeline_mode = #tpu.pipeline_mode<synchronous>, transform_indices = @transform_2, window_bounds = array<i64: 128, 128>}, {pipeline_mode = #tpu.pipeline_mode<synchronous>, transform_indices = @transform_3, window_bounds = array<i64: 8, 128>}]} {
    %c0_i32 = arith.constant 0 : i32
    %0 = arith.cmpi eq, %arg0, %c0_i32 : i32
    %1 = arith.extui %0 : i1 to i32
    %c0_i32_0 = arith.constant 0 : i32
    %2 = arith.cmpi ne, %1, %c0_i32_0 : i32
    scf.if %2 {
      %cst_14 = arith.constant 0.000000e+00 : f32
      %24 = vector.broadcast %cst_14 : f32 to vector<8x128xf32>
      %c0_15 = arith.constant 0 : index
      %c0_16 = arith.constant 0 : index
      %25 = vector.load %arg5[%c0_15, %c0_16] : memref<8x128xf32, #tpu.memory_space<vmem>>, vector<8x128xf32>
      tpu.vector_store %arg5[%c0_15, %c0_16], %24 {strides = array<i32>} : memref<8x128xf32, #tpu.memory_space<vmem>>, vector<8x128xf32>,
      %cst_17 = arith.constant 0.000000e+00 : f32
      %26 = vector.broadcast %cst_17 : f32 to vector<8x1xf32>
      %c0_18 = arith.constant 0 : index
      %c0_19 = arith.constant 0 : index
      %27 = vector.load %arg6[%c0_18, %c0_19] : memref<8x1xf32, #tpu.memory_space<vmem>>, vector<8x1xf32>
      tpu.vector_store %arg6[%c0_18, %c0_19], %26 {strides = array<i32>} : memref<8x1xf32, #tpu.memory_space<vmem>>, vector<8x1xf32>,
    } else {
    }
    %c0 = arith.constant 0 : index
    %c0_1 = arith.constant 0 : index
    %3 = vector.load %arg1[%c0, %c0_1] : memref<1x512xi32, #tpu.memory_space<vmem>>, vector<1x512xi32>
    %4 = vector.shape_cast %3 : vector<1x512xi32> to vector<512xi32>
    %5 = tpu.iota {dimensions = array<i32: 0>} : vector<8x512xi32>
    %6 = vector.shape_cast %4 : vector<512xi32> to vector<1x512xi32>
    %7 = vector.broadcast %6 : vector<1x512xi32> to vector<8x512xi32>
    %8 = arith.cmpi eq, %5, %7 : vector<8x512xi32>
    %9 = arith.extui %8 : vector<8x512xi1> to vector<8x512xi32>
    %10 = arith.sitofp %9 : vector<8x512xi32> to vector<8x512xf32>
    %c0_2 = arith.constant 0 : index
    %c0_3 = arith.constant 0 : index
    %11 = vector.load %arg5[%c0_2, %c0_3] : memref<8x128xf32, #tpu.memory_space<vmem>>, vector<8x128xf32>
    %c0_4 = arith.constant 0 : index
    %c0_5 = arith.constant 0 : index
    %12 = vector.load %arg2[%c0_4, %c0_5] : memref<512x128xf32, #tpu.memory_space<vmem>>, vector<512x128xf32>
    %cst = arith.constant dense<0.000000e+00> : vector<8x128xf32>
    %13 = tpu.matmul %10, %12, %cst {dimension_numbers = #tpu.dot_dimension_numbers<[1], [0], [0], [1], [0, 0, 1, 1], [], []>} : vector<8x512xf32>, vector<512x128xf32>, vector<8x128xf32> -> vector<8x128xf32>
    %14 = arith.addf %11, %13 : vector<8x128xf32>
    %c0_6 = arith.constant 0 : index
    %c0_7 = arith.constant 0 : index
    %15 = vector.load %arg5[%c0_6, %c0_7] : memref<8x128xf32, #tpu.memory_space<vmem>>, vector<8x128xf32>
    tpu.vector_store %arg5[%c0_6, %c0_7], %14 {strides = array<i32>} : memref<8x128xf32, #tpu.memory_space<vmem>>, vector<8x128xf32>,
    %c0_8 = arith.constant 0 : index
    %c0_9 = arith.constant 0 : index
    %16 = vector.load %arg6[%c0_8, %c0_9] : memref<8x1xf32, #tpu.memory_space<vmem>>, vector<8x1xf32>
    %cst_10 = arith.constant dense<0.000000e+00> : vector<8xf32>
    %17 = vector.multi_reduction <add>, %10, %cst_10 [1] : vector<8x512xf32> to vector<8xf32>
    %18 = vector.shape_cast %17 : vector<8xf32> to vector<8x1xf32>
    %19 = arith.addf %16, %18 : vector<8x1xf32>
    %c0_11 = arith.constant 0 : index
    %c0_12 = arith.constant 0 : index
    %20 = vector.load %arg6[%c0_11, %c0_12] : memref<8x1xf32, #tpu.memory_space<vmem>>, vector<8x1xf32>
    tpu.vector_store %arg6[%c0_11, %c0_12], %19 {strides = array<i32>} : memref<8x1xf32, #tpu.memory_space<vmem>>, vector<8x1xf32>,
    %c1_i32 = arith.constant 1 : i32
    %21 = arith.cmpi eq, %arg0, %c1_i32 : i32
    %22 = arith.extui %21 : i1 to i32
    %c0_i32_13 = arith.constant 0 : i32
    %23 = arith.cmpi ne, %22, %c0_i32_13 : i32
    scf.if %23 {
      %c0_14 = arith.constant 0 : index
      %c0_15 = arith.constant 0 : index
      %24 = vector.load %arg5[%c0_14, %c0_15] : memref<8x128xf32, #tpu.memory_space<vmem>>, vector<8x128xf32>
      %c0_16 = arith.constant 0 : index
      %c0_17 = arith.constant 0 : index
      %25 = vector.load %arg3[%c0_16, %c0_17] : memref<128x128xf32, #tpu.memory_space<vmem>>, vector<128x128xf32>
      %cst_18 = arith.constant dense<0.000000e+00> : vector<8x128xf32>
      %26 = tpu.matmul %24, %25, %cst_18 {dimension_numbers = #tpu.dot_dimension_numbers<[1], [0], [0], [1], [0, 0, 1, 1], [], []>} : vector<8x128xf32>, vector<128x128xf32>, vector<8x128xf32> -> vector<8x128xf32>
      %c0_19 = arith.constant 0 : index
      %c0_20 = arith.constant 0 : index
      %27 = vector.load %arg6[%c0_19, %c0_20] : memref<8x1xf32, #tpu.memory_space<vmem>>, vector<8x1xf32>
      %cst_21 = arith.constant 1.000000e+00 : f32
      %28 = vector.broadcast %cst_21 : f32 to vector<8x1xf32>
      %29 = arith.maximumf %27, %28 : vector<8x1xf32>
      %cst_22 = arith.constant 1.000000e+00 : f32
      %30 = vector.broadcast %cst_22 : f32 to vector<8x1xf32>
      %31 = arith.divf %30, %29 : vector<8x1xf32>
      %32 = vector.broadcast %31 : vector<8x1xf32> to vector<8x128xf32>
      %33 = arith.mulf %26, %32 : vector<8x128xf32>
      %c0_23 = arith.constant 0 : index
      %c0_24 = arith.constant 0 : index
      %34 = vector.load %arg4[%c0_23, %c0_24] : memref<8x128xf32, #tpu.memory_space<vmem>>, vector<8x128xf32>
      tpu.vector_store %arg4[%c0_23, %c0_24], %33 {strides = array<i32>} : memref<8x128xf32, #tpu.memory_space<vmem>>, vector<8x128xf32>,
    } else {
    }
    return
  }
  func.func @transform_0(%arg0: i32) -> (i32, i32) {
    %c0_i32 = arith.constant 0 : i32
    %c0_i32_0 = arith.constant 0 : i32
    return %c0_i32, %arg0 : i32, i32
  }
  func.func @transform_1(%arg0: i32) -> (i32, i32) {
    %c0_i32 = arith.constant 0 : i32
    %c0_i32_0 = arith.constant 0 : i32
    return %arg0, %c0_i32 : i32, i32
  }
  func.func @transform_2(%arg0: i32) -> (i32, i32) {
    %c0_i32 = arith.constant 0 : i32
    %c0_i32_0 = arith.constant 0 : i32
    %c0_i32_1 = arith.constant 0 : i32
    return %c0_i32, %c0_i32_0 : i32, i32
  }
  func.func @transform_3(%arg0: i32) -> (i32, i32) {
    %c0_i32 = arith.constant 0 : i32
    %c0_i32_0 = arith.constant 0 : i32
    %c0_i32_1 = arith.constant 0 : i32
    return %c0_i32, %c0_i32_0 : i32, i32
  }
}

</mosaic_0001>

<bundles_post_ra>
// kernel: tpu_custom_call.1
= control target key start
LH: loop header
LB: loop body
LE: loop exit
PB: predicated region body
PF: predicated region fallthrough
CT: control target
= control target key end

     0   :  { %8 = vsyncpa [#allocation5], 0  ;;  %s1104_s0 = inlined_call_operand.hbm [shape: s32[1,1024], index: 0, kind: input, shape index: {}]   ;;  %s1105_s1 = inlined_call_operand.hbm [shape: f32[1024,128], index: 1, kind: input, shape index: {}]   ;;  %s1106_s2 = inlined_call_operand.hbm [shape: f32[128,128], index: 2, kind: input, shape index: {}]   ;;  %s1107_s3 = inlined_call_operand.hbm [shape: f32[8,128], index: 3, kind: output, shape index: {}]  }
   0x1   :  { %10 = vsyncpa [#allocation5 + $0x1], 0 }
   0x2   :  { %11 = vsyncpa [#allocation8], 0 }
   0x3   :  { %13 = vsyncpa [#allocation8 + $0x1], 0 }
   0x4   :  { %14 = vsyncpa [#allocation6], 0  ;;  %s867_s12 = smov 0   ;;  %s869_s13 = smov 0  }
   0x5   :  { %s871_s14 = smov 0   ;;  %s873_s15 = smov 0  }
   0x6 LB: > { %s130_s18 = sshll.u32 %s1106_s2, 4  ;;  %s889_s19 = sadd.s32 4294967295, %s837_s15   ;;  %s837_s15 = sphi %s873_s15, %s1124_s15   ;;  %s833_s14 = sphi %s871_s14, %s1123_s14   ;;  %s829_s13 = sphi %s869_s13, %s1122_s13   ;;  %s825_s12 = sphi %s867_s12, %s1121_s12   ;;  %s131_s18 = int_to_ptr.hbm [resolvable:$true] %s130_s18 }
   0x7   : > { %p575_p0 = scmp.ge.s32.totalorder %s837_s15, 1  ;;  %p41_p1 = scmp.eq.s32.totalorder %s889_s19, 0 }
   0x8   : > { %p119_p2 = scmp.lt.s32.totalorder %s837_s15, 3  ;;  %p576_p3 = scmp.ne.s32.totalorder %s889_s19, 0 }
   0x9   : > { %s839_s21 = smov [#allocation9]   ;;  %s1108_s23 = smov 128  }
   0xa   : > { %p895_p4 = pnand %p575_p0, %p119_p2  ;;  %s132_s22 = sshll.u32 %s839_s21, 4  ;;  %s133_s22 = int_to_ptr.vmem [resolvable:$true] %s132_s22 }
   0xb   : > { %s841_s24 = smov 8   ;;  %s907_s25 = sadd.s32 1, %s837_s15  }
   0xc   : > { %p614_p5 = pneg %p895_p4  ;;  %s24_s26 = ssub.s32 %s837_s15, %s907_s25 }
   0xd   : > { %s27_s27 = sadd.s32 1, %s833_s14  ;;  %p25_p7 = scmp.eq.s32.totalorder %s24_s26, 0 }
   0xe   : > { %p615_p6 = pnand %p614_p5, %p41_p1  ;;  %p34_p8 = scmp.ne.s32.totalorder %s833_s14, %s829_s13 }
   0xf   : > { %p35_p9 = scmp.eq.s32.totalorder %s837_s15, 0  ;;  %p40_p10 = scmp.ne.s32.totalorder %s829_s13, %s825_s12 }
  0x10   : > { %617 = dma.hbm_to_vmem [thread:$0]  (!%p615_p6), %s131_s18, 2048, %s133_s22, [#allocation8], %s1108_s23, %s1108_s23, %s841_s24  }
  0x11   : > { %s917_s28 = scalar_select %p25_p7, %s833_s14, %s27_s27  }
  0x12   : > { %p36_p11 = por %p35_p9, %p34_p8  ;;  %p921_p12 = por %p41_p1, %p40_p10 }
  0x13   : > { %p626_p13 = scmp.lt.s32.totalorder %s837_s15, 2  ;;  %s146_s30 = sand.u32 1, %s833_s14  }
  0x14   : > { %s578_s4 = sshll.u32 %s146_s30, 2  ;;  %s579_s5 = sshll.u32 %s837_s15, 2 }
  0x15   : > { %s154_s8 = scalar_lea.hbm %s1104_s0, %s579_s5  ;;  %s150_s9 = scalar_lea.vmem [#allocation4], %s578_s4 }
  0x16   : > { %s158_s10 = sshll.u32 %s150_s9, 4  ;;  %s156_s11 = sshll.u32 %s154_s8, 4  ;;  %s159_s10 = int_to_ptr.vmem [resolvable:$true] %s158_s10  ;;  %s157_s11 = int_to_ptr.hbm [resolvable:$true] %s156_s11 }
  0x17   : > { %p931_p0 = pnand %p626_p13, %p36_p11  ;;  %s580_s16 = sshll.u32 %s146_s30, 9 }
  0x18   : > { %s165_s17 = sand.u32 1, %s837_s15   ;;  %s147_s18 = scalar_lea.sflag [#allocation5], %s146_s30 }
  0x19   : > { %s703_s21 = sshra.s32 %s157_s11, 4  ;;  %p707_p5 = pneg %p931_p0  ;;  %s704_s21 = int_to_ptr.hbm [resolvable:$true] %s703_s21 }
  0x1a   : > { %s705_s22 = scalar_lea.hbm %s704_s21, 4  ;;  %s710_s4 = scalar_lea.hbm %s1104_s0, 8 }
  0x1b   : > { %p706_p2 = scmp.ne.s32.totalorder %s704_s21, %s705_s22  ;;  %p711_p8 = scmp.lt.s32.totalorder %s704_s21, %s1104_s0 }
  0x1c   : > { %p712_p9 = scmp.lt.s32.totalorder %s710_s4, %s705_s22 }
  0x1d   : > { %p708_p6 = pnand %p707_p5, %p706_p2 }
  0x1e   : > { %p713_p10 = por %p712_p9, %p711_p8 }
  0x1f   : > { %p709_p7 = pneg %p708_p6 }
  0x21   : > { %p714_p11 = pnand %p713_p10, %p709_p7 }
  0x23   : > { %717 = shalt.err (!%p714_p11)
}
  0x24   : > { %621 = dma.hbm_to_vmem [thread:$0]  (!%p931_p0), %s157_s11, 64, %s159_s10, %s147_s18  }
  0x25   : > { %s169_s30 = scalar_lea.vmem [#allocation7], %s580_s16  ;;  %s601_s8 = sshll.u32 %s837_s15, 9 }
  0x26   : > { %s177_s7 = sshll.u32 %s169_s30, 4  ;;  %s174_s27 = scalar_lea.hbm %s1105_s1, %s601_s8  ;;  %s178_s7 = int_to_ptr.vmem [resolvable:$true] %s177_s7 }
  0x27   : > { %s175_s23 = sshll.u32 %s174_s27, 4  ;;  %s166_s21 = scalar_lea.sflag [#allocation8], %s165_s17  ;;  %s176_s23 = int_to_ptr.hbm [resolvable:$true] %s175_s23 }
  0x28   : > { %s733_s22 = sshra.s32 %s176_s23, 4  ;;  %s740_s15 = scalar_lea.hbm %s1105_s1, 1024  ;;  %s734_s22 = int_to_ptr.hbm [resolvable:$true] %s733_s22 }
  0x29   : > { %s735_s4 = scalar_lea.hbm %s734_s22, 512  ;;  %p741_p7 = scmp.lt.s32.totalorder %s734_s22, %s1105_s1 }
  0x2a   : > { %p736_p13 = scmp.ne.s32.totalorder %s734_s22, %s735_s4  ;;  %p742_p8 = scmp.lt.s32.totalorder %s740_s15, %s735_s4 }
  0x2c   : > { %p738_p2 = pnand %p736_p13, %p707_p5  ;;  %p743_p9 = por %p742_p8, %p741_p7 }
  0x2e   : > { %p739_p6 = pneg %p738_p2 }
  0x30   : > { %p744_p10 = pnand %p743_p9, %p739_p6 }
  0x32   : > { %747 = shalt.err (!%p744_p10)
}
  0x33   : > { %s1112_s17 = smov 128   ;;  %189 = sbr.rel (%p895_p4) target bundleno = 408 (0x198), region = 32 }
  0x34   : > { %624 = dma.hbm_to_vmem [thread:$0]  (!%p931_p0), %s176_s23, 8192, %s178_s7, %s166_s21, %s1112_s17, %s1112_s17, %s841_s24  }
  0x35   : > { %s191_s5 = sand.u32 (!%p895_p4), 1, %s829_s13  }
  0x36   : > { %s584_s6 = sshll.u32 (!%p895_p4), %s191_s5, 2  ;;  %s192_s30 = scalar_lea.sflag (!%p895_p4), [#allocation5], %s191_s5 }
  0x37   : > { %s970_s8 = scalar_lea.vmem (!%p895_p4), [#allocation4], %s584_s6 }
  0x38   : > { %808 = dma.done.wait (%p921_p12), %s192_s30, 64  }
  0x39   : > { %810 = vsyncadd (%p921_p12), %s192_s30, 4294967232  ;;  %s201_s12 = sand.u32 1, %s889_s19   ;;  %s585_s9 = sshll.u32 %s191_s5, 9 }
  0x3a   : > { %s202_s23 = scalar_lea.sflag [#allocation8], %s201_s12  ;;  %s977_s24 = scalar_lea.vmem [#allocation7], %s585_s9 }
  0x3b   : > { %812 = dma.done.wait (%p921_p12), %s202_s23, 8192  }
  0x3c   : > { %814 = vsyncadd (%p921_p12), %s202_s23, 4294959104 }
  0x3d   : > { %816 = dma.done.wait (%p41_p1), [#allocation8], 2048  }
  0x3e   : > { %818 = vsyncadd (%p41_p1), [#allocation8], 4294965248  ;;  %239 = sbr.rel (%p576_p3) target bundleno = 70 (0x46), region = 48 }
  0x43   : > { %vm241_vm0 = vcmask 7168   ;;  %v842_v0 = vmov 0.0  }
  0x44   : > { %240 = vst [vmem:[#allocation2] sm:$0xff] %v842_v0 }
  0x45   : > { %242 = vst.msk [vmem:[#allocation3] sm:$0xff] %vm241_vm0, %v842_v0 }
  0x46 PF: > { %v310_v1 = vld [vmem:[%s977_s24 + $0x178] sm:$0xff]  ;;  %v309_v2 = vld [vmem:[%s977_s24 + $0x170] sm:$0xff]  ;;  %v308_v6 = vld [vmem:[%s977_s24 + $0x168] sm:$0xff]  ;;  %v244_v37 = vlaneseq  ;;  %v843_v62 = vmov 0.0   ;;  %vm416_vm5 = vcmask 7168   ;;  %p596_p1 = scmp.ne.s32.totalorder %s889_s19, 1 }
  0x47   : > { %v326_v3 = vld [vmem:[%s977_s24 + $0x1f8] sm:$0xff]  ;;  %367 = vmatpush.msra.mxu2 %v310_v1  ;;  %v325_v7 = vld [vmem:[%s977_s24 + $0x1f0] sm:$0xff]  ;;  %v324_v10 = vld [vmem:[%s977_s24 + $0x1e8] sm:$0xff] }
  0x48   : > { %387 = vmatpush.msra.mxu3 %v326_v3  ;;  %v278_v4 = vld [vmem:[%s977_s24 + $0x78] sm:$0xff]  ;;  %v277_v8 = vld [vmem:[%s977_s24 + $0x70] sm:$0xff]  ;;  %v276_v11 = vld [vmem:[%s977_s24 + $0x68] sm:$0xff]  ;;  %v245_v47 = vshrl.u32 %v244_v37, 7 }
  0x49   : > { %v294_v5 = vld [vmem:[%s977_s24 + $0xf8] sm:$0xff]  ;;  %327 = vmatpush.msra.mxu0 %v278_v4  ;;  %v293_v9 = vld [vmem:[%s977_s24 + $0xf0] sm:$0xff]  ;;  %368 = vmatpush.msra.mxu2 %v309_v2  ;;  %v307_v12 = vld [vmem:[%s977_s24 + $0x160] sm:$0xff] }
  0x4a   : > { %347 = vmatpush.msra.mxu1 %v294_v5  ;;  %388 = vmatpush.msra.mxu3 %v325_v7  ;;  %v292_v13 = vld [vmem:[%s977_s24 + $0xe8] sm:$0xff]  ;;  %v323_v14 = vld [vmem:[%s977_s24 + $0x1e0] sm:$0xff]  ;;  %v306_v17 = vld [vmem:[%s977_s24 + $0x158] sm:$0xff] }
  0x4b   : > { %328 = vmatpush.msra.mxu0 %v277_v8  ;;  %369 = vmatpush.msra.mxu2 %v308_v6  ;;  %v275_v15 = vld [vmem:[%s977_s24 + $0x60] sm:$0xff]  ;;  %v322_v18 = vld [vmem:[%s977_s24 + $0x1d8] sm:$0xff]  ;;  %v305_v21 = vld [vmem:[%s977_s24 + $0x150] sm:$0xff] }
  0x4c   : > { %348 = vmatpush.msra.mxu1 %v293_v9  ;;  %389 = vmatpush.msra.mxu3 %v324_v10  ;;  %v291_v16 = vld [vmem:[%s977_s24 + $0xe0] sm:$0xff]  ;;  %v274_v19 = vld [vmem:[%s977_s24 + $0x58] sm:$0xff]  ;;  %v321_v22 = vld [vmem:[%s977_s24 + $0x1d0] sm:$0xff] }
  0x4d   : > { %329 = vmatpush.msra.mxu0 %v276_v11  ;;  %370 = vmatpush.msra.mxu2 %v307_v12  ;;  %v290_v20 = vld [vmem:[%s977_s24 + $0xd8] sm:$0xff]  ;;  %v273_v23 = vld [vmem:[%s977_s24 + $0x50] sm:$0xff]  ;;  %v304_v25 = vld [vmem:[%s977_s24 + $0x148] sm:$0xff] }
  0x4e   : > { %349 = vmatpush.msra.mxu1 %v292_v13  ;;  %390 = vmatpush.msra.mxu3 %v323_v14  ;;  %v289_v24 = vld [vmem:[%s977_s24 + $0xd0] sm:$0xff]  ;;  %v320_v26 = vld [vmem:[%s977_s24 + $0x1c8] sm:$0xff]  ;;  %v303_v29 = vld [vmem:[%s977_s24 + $0x140] sm:$0xff] }
  0x4f   : > { %330 = vmatpush.msra.mxu0 %v275_v15  ;;  %371 = vmatpush.msra.mxu2 %v306_v17  ;;  %v272_v27 = vld [vmem:[%s977_s24 + $0x48] sm:$0xff]  ;;  %v319_v30 = vld [vmem:[%s977_s24 + $0x1c0] sm:$0xff]  ;;  %v302_v33 = vld [vmem:[%s977_s24 + $0x138] sm:$0xff] }
  0x50   : > { %350 = vmatpush.msra.mxu1 %v291_v16  ;;  %391 = vmatpush.msra.mxu3 %v322_v18  ;;  %v288_v28 = vld [vmem:[%s977_s24 + $0xc8] sm:$0xff]  ;;  %v271_v31 = vld [vmem:[%s977_s24 + $0x40] sm:$0xff]  ;;  %v318_v34 = vld [vmem:[%s977_s24 + $0x1b8] sm:$0xff] }
  0x51   : > { %331 = vmatpush.msra.mxu0 %v274_v19  ;;  %372 = vmatpush.msra.mxu2 %v305_v21  ;;  %v287_v32 = vld [vmem:[%s977_s24 + $0xc0] sm:$0xff]  ;;  %v270_v35 = vld [vmem:[%s977_s24 + $0x38] sm:$0xff]  ;;  %v301_v38 = vld [vmem:[%s977_s24 + $0x130] sm:$0xff] }
  0x52   : > { %351 = vmatpush.msra.mxu1 %v290_v20  ;;  %392 = vmatpush.msra.mxu3 %v321_v22  ;;  %v286_v36 = vld [vmem:[%s977_s24 + $0xb8] sm:$0xff]  ;;  %v317_v39 = vld [vmem:[%s977_s24 + $0x1b0] sm:$0xff]  ;;  %v300_v42 = vld [vmem:[%s977_s24 + $0x128] sm:$0xff]  ;;  %v844_v20 = vmov 1.0  }
  0x53   : > { %332 = vmatpush.msra.mxu0 %v273_v23  ;;  %373 = vmatpush.msra.mxu2 %v304_v25  ;;  %v269_v40 = vld [vmem:[%s977_s24 + $0x30] sm:$0xff]  ;;  %v316_v43 = vld [vmem:[%s977_s24 + $0x1a8] sm:$0xff]  ;;  %v243_v46 = vld [vmem:[%s970_s8] sm:$0xf] }
  0x54   : > { %352 = vmatpush.msra.mxu1 %v289_v24  ;;  %393 = vmatpush.msra.mxu3 %v320_v26  ;;  %v285_v41 = vld [vmem:[%s977_s24 + $0xb0] sm:$0xff]  ;;  %v268_v44 = vld [vmem:[%s977_s24 + $0x28] sm:$0xff]  ;;  %v299_v48 = vld [vmem:[%s977_s24 + $0x120] sm:$0xff]  ;;  %v248_v50 = vperm.slane %v243_v46, 2  ;;  %v246_v51 = vperm.slane %v243_v46, 0  ;;  %v247_v54 = vperm.slane %v243_v46, 1 }
  0x55   : > { %333 = vmatpush.msra.mxu0 %v272_v27  ;;  %374 = vmatpush.msra.mxu2 %v303_v29  ;;  %v284_v45 = vld [vmem:[%s977_s24 + $0xa8] sm:$0xff]  ;;  %v315_v49 = vld [vmem:[%s977_s24 + $0x1a0] sm:$0xff]  ;;  %v298_v55 = vld [vmem:[%s977_s24 + $0x118] sm:$0xff]  ;;  %v249_v61 = vperm.slane %v243_v46, 3 }
  0x56   : > { %353 = vmatpush.msra.mxu1 %v288_v28  ;;  %394 = vmatpush.msra.mxu3 %v319_v30  ;;  %v267_v52 = vld [vmem:[%s977_s24 + $0x20] sm:$0xff]  ;;  %v314_v56 = vld [vmem:[%s977_s24 + $0x198] sm:$0xff]  ;;  %vm1040_vm1 = vcmp.eq.s32.totalorder %v245_v47, %v246_v51  ;;  %vm1046_vm2 = vcmp.eq.s32.totalorder %v245_v47, %v248_v50  ;;  %vm1052_vm3 = vcmp.eq.s32.totalorder %v245_v47, %v247_v54  ;;  %v297_v1 = vld [vmem:[%s977_s24 + $0x110] sm:$0xff] }
  0x57   : > { %334 = vmatpush.msra.mxu0 %v271_v31  ;;  %375 = vmatpush.msra.mxu2 %v302_v33  ;;  %v283_v53 = vld [vmem:[%s977_s24 + $0xa0] sm:$0xff]  ;;  %v266_v58 = vld [vmem:[%s977_s24 + $0x18] sm:$0xff]  ;;  %v588_v63 = vsel %vm1040_vm1, 1.0, %v843_v62  ;;  %v313_v2 = vld [vmem:[%s977_s24 + $0x190] sm:$0xff]  ;;  %v590_v3 = vsel %vm1046_vm2, 1.0, %v843_v62  ;;  %v589_v4 = vsel %vm1052_vm3, 1.0, %v843_v62  ;;  %vm1068_vm4 = vcmp.eq.s32.totalorder %v245_v47, %v249_v61 }
  0x58   : > { %354 = vmatpush.msra.mxu1 %v287_v32  ;;  %395 = vmatpush.msra.mxu3 %v318_v34  ;;  %v282_v59 = vld [vmem:[%s977_s24 + $0x98] sm:$0xff]  ;;  %v265_v5 = vld [vmem:[%s977_s24 + $0x10] sm:$0xff]  ;;  %v410_v7 = vadd.f32 %v589_v4, %v588_v63  ;;  %v296_v8 = vld [vmem:[%s977_s24 + $0x108] sm:$0xff]  ;;  %v591_v16 = vsel %vm1068_vm4, 1.0, %v843_v62 }
  0x59   : > { %335 = vmatpush.msra.mxu0 %v270_v35  ;;  %376 = vmatpush.msra.mxu2 %v301_v38  ;;  %v281_v6 = vld [vmem:[%s977_s24 + $0x90] sm:$0xff]  ;;  %v312_v9 = vld [vmem:[%s977_s24 + $0x188] sm:$0xff]  ;;  %v295_v14 = vld [vmem:[%s977_s24 + $0x100] sm:$0xff] }
  0x5a   : > { %355 = vmatpush.msra.mxu1 %v286_v36  ;;  %396 = vmatpush.msra.mxu3 %v317_v39  ;;  %v264_v10 = vld [vmem:[%s977_s24 + $0x8] sm:$0xff]  ;;  %v411_v13 = vadd.f32 %v590_v3, %v410_v7  ;;  %v311_v15 = vld [vmem:[%s977_s24 + $0x180] sm:$0xff]  ;;  %v409_v21 = vld [vmem:[#allocation3] sm:$0xff] }
  0x5b   : > { %336 = vmatpush.msra.mxu0 %v269_v40  ;;  %377 = vmatpush.msra.mxu2 %v300_v42  ;;  %v280_v11 = vld [vmem:[%s977_s24 + $0x88] sm:$0xff]  ;;  %v263_v17 = vld [vmem:[%s977_s24] sm:$0xff] }
  0x5c   : > { %356 = vmatpush.msra.mxu1 %v285_v41  ;;  %397 = vmatpush.msra.mxu3 %v316_v43  ;;  %v279_v18 = vld [vmem:[%s977_s24 + $0x80] sm:$0xff]  ;;  %v412_v19 = vadd.f32 %v591_v16, %v411_v13  ;;  %v262_v30 = vld [vmem:[#allocation2] sm:$0xff] }
  0x5d   : > { %337 = vmatpush.msra.mxu0 %v268_v44  ;;  %378 = vmatpush.msra.mxu2 %v299_v48 }
  0x5e   : > { %357 = vmatpush.msra.mxu1 %v284_v45  ;;  %398 = vmatpush.msra.mxu3 %v315_v49 }
  0x5f   : > { %338 = vmatpush.msra.mxu0 %v267_v52  ;;  %379 = vmatpush.msra.mxu2 %v298_v55 }
  0x60   : > { %358 = vmatpush.msra.mxu1 %v283_v53  ;;  %399 = vmatpush.msra.mxu3 %v314_v56 }
  0x61   : > { %339 = vmatpush.msra.mxu0 %v266_v58  ;;  %380 = vmatpush.msra.mxu2 %v297_v1 }
  0x62   : > { %359 = vmatpush.msra.mxu1 %v282_v59  ;;  %400 = vmatpush.msra.mxu3 %v313_v2 }
  0x63   : > { %340 = vmatpush.msra.mxu0 %v265_v5  ;;  %381 = vmatpush.msra.mxu2 %v296_v8 }
  0x64   : > { %360 = vmatpush.msra.mxu1 %v281_v6  ;;  %401 = vmatpush.msra.mxu3 %v312_v9 }
  0x65   : > { %341 = vmatpush.msra.mxu0 %v264_v10  ;;  %382 = vmatpush.msra.mxu2 %v295_v14 }
  0x66   : > { %361 = vmatpush.msra.mxu1 %v280_v11  ;;  %402 = vmatpush.msra.mxu3 %v311_v15 }
  0x67   : > { %594 = vmatmul.msk.f32.vlgmr.msra.gmra.mxu2 %vm1046_vm2, %v844_v20  ;;  %595 = vmatmul.msk.f32.vlgmr.msra.gmra.mxu3 %vm1068_vm4, %v844_v20 }
  0x68   : > { %342 = vmatpush.msra.mxu0 %v263_v17  ;;  %362 = vmatpush.msra.mxu1 %v279_v18 }
  0x69   : > { %592 = vmatmul.msk.f32.vlgmr.msra.gmra.mxu0 %vm1040_vm1, %v844_v20  ;;  %593 = vmatmul.msk.f32.vlgmr.msra.gmra.mxu1 %vm1052_vm3, %v844_v20 }
  0x6a   : > { %413 = vadd.xlane.f32.xlu0 %v412_v19 }
  0xdd   : > { %v414_v22 = vpop.xlane.xlu0 %413 }
  0xde   : > { %v415_v23 = vadd.f32 %v414_v22, %v409_v21 }
  0xe0   : > { %417 = vst.msk [vmem:[#allocation3] sm:$0xff] %vm416_vm5, %v415_v23 }
  0xe6   : > { %v344_v24 = vpop.f32.mrf.mxu0  ;;  %v364_v25 = vpop.f32.mrf.mxu1 }
  0xe7   : > { %v365_v26 = vadd.f32 %v364_v25, %v344_v24 }
  0xea   : > { %v384_v27 = vpop.f32.mrf.mxu2  ;;  %v404_v28 = vpop.f32.mrf.mxu3 }
  0xeb   : > { %v385_v29 = vadd.f32 %v384_v27, %v365_v26 }
  0xed   : > { %v405_v31 = vadd.f32 %v404_v28, %v385_v29  ;;  %421 = sbr.rel (%p596_p1) target bundleno = 403 (0x193), region = 52 }
  0xef   : > { %v407_v32 = vadd.f32 %v405_v31, %v262_v30 }
  0xf1   : > { %408 = vst [vmem:[#allocation2] sm:$0xff] %v407_v32 }
  0xf2   : > { %v438_v33 = vld [vmem:[#allocation9 + $0x78] sm:$0xff]  ;;  %v437_v34 = vld [vmem:[#allocation9 + $0x70] sm:$0xff]  ;;  %v845_v35 = vmov 0   ;;  %v436_v36 = vld [vmem:[#allocation9 + $0x68] sm:$0xff] }
  0xf3   : > { %439 = vmatpush.msra.mxu0 %v438_v33  ;;  %670 = vset.pattern.permute.xlu0 %v845_v35  ;;  %v435_v37 = vld [vmem:[#allocation9 + $0x60] sm:$0xff]  ;;  %v459_v38 = vld [vmem:[#allocation3] sm:$0xff]  ;;  %v434_v39 = vld [vmem:[#allocation9 + $0x58] sm:$0xff] }
  0xf4   : > { %v460_v40 = vmax.f32 %v459_v38, 1.0  ;;  %v433_v41 = vld [vmem:[#allocation9 + $0x50] sm:$0xff]  ;;  %v432_v42 = vld [vmem:[#allocation9 + $0x48] sm:$0xff]  ;;  %v431_v43 = vld [vmem:[#allocation9 + $0x40] sm:$0xff] }
  0xf5   : > { %440 = vmatpush.msra.mxu0 %v437_v34  ;;  %v430_v45 = vld [vmem:[#allocation9 + $0x38] sm:$0xff]  ;;  %v429_v47 = vld [vmem:[#allocation9 + $0x30] sm:$0xff]  ;;  %v428_v51 = vld [vmem:[#allocation9 + $0x28] sm:$0xff] }
  0xf6   : > { %671 = vrcp.f32 %v460_v40  ;;  %v472_v48 = vand.u32 2147483648, %v460_v40  ;;  %vm466_vm6 = vweird.f32 %v460_v40  ;;  %v470_v50 = vand.u32 2147483647, %v460_v40  ;;  %v427_v53 = vld [vmem:[#allocation9 + $0x20] sm:$0xff]  ;;  %v426_v56 = vld [vmem:[#allocation9 + $0x18] sm:$0xff]  ;;  %v425_v58 = vld [vmem:[#allocation9 + $0x10] sm:$0xff] }
  0xf7   : > { %441 = vmatpush.msra.mxu0 %v436_v36  ;;  %v424_v60 = vld [vmem:[#allocation9 + $0x8] sm:$0xff]  ;;  %v423_v61 = vld [vmem:[#allocation9] sm:$0xff] }
  0xf8   : > { %v473_v54 = vor.u32 1.1754944e-38, %v472_v48  ;;  %vm471_vm9 = vcmp.eq.f32.partialorder %v470_v50, 8.507059e+37  ;;  %v422_v62 = vld [vmem:[#allocation2] sm:$0xff] }
  0xf9   : > { %442 = vmatpush.msra.mxu0 %v435_v37 }
  0xfb   : > { %443 = vmatpush.msra.mxu0 %v434_v39 }
  0xfc   : > { %v672_v44 = vpop.eup %671 }
  0xfd   : > { %444 = vmatpush.msra.mxu0 %v433_v41  ;;  %v462_v46 = vmul.f32 %v672_v44, %v460_v40  ;;  %vm467_vm7 = vweird.f32 %v672_v44 }
  0xfe   : > { %vm468_vm8 = vmor %vm466_vm6, %vm467_vm7 }
  0xff   : > { %445 = vmatpush.msra.mxu0 %v432_v42  ;;  %v463_v49 = vsub.f32 1.0, %v462_v46 }
 0x101   : > { %446 = vmatpush.msra.mxu0 %v431_v43  ;;  %v464_v52 = vmul.f32 %v672_v44, %v463_v49 }
 0x103   : > { %447 = vmatpush.msra.mxu0 %v430_v45  ;;  %v465_v55 = vadd.f32 %v672_v44, %v464_v52 }
 0x105   : > { %448 = vmatpush.msra.mxu0 %v429_v47  ;;  %v469_v57 = vsel %vm468_vm8, %v672_v44, %v465_v55 }
 0x106   : > { %v474_v59 = vsel %vm471_vm9, %v473_v54, %v469_v57 }
 0x107   : > { %449 = vmatpush.msra.mxu0 %v428_v51  ;;  %478 = vperm.xlu0 %670, %v474_v59  }
 0x109   : > { %450 = vmatpush.msra.mxu0 %v427_v53 }
 0x10b   : > { %451 = vmatpush.msra.mxu0 %v426_v56 }
 0x10d   : > { %452 = vmatpush.msra.mxu0 %v425_v58 }
 0x10f   : > { %453 = vmatpush.msra.mxu0 %v424_v60 }
 0x111   : > { %454 = vmatpush.msra.mxu0 %v423_v61 }
 0x112   : > { %455 = vmatmul.f32.vlgmr.msra.gmra.mxu0 %v422_v62 }
 0x179   : > { %v479_v63 = vpop.permute.xlu0 %478 }
 0x18f   : > { %v456_v0 = vpop.f32.mrf.mxu0 }
 0x190   : > { %v481_v1 = vmul.f32 %v479_v63, %v456_v0 }
 0x192   : > { %482 = vst [vmem:[#allocation10] sm:$0xff] %v481_v1 }
 0x193 PF: > { %p628_p3 = scmp.eq.s32.totalorder %s889_s19, 1  ;;  %s846_s20 = smov [#allocation10]  }
 0x194   : > { %s489_s29 = sshll.u32 %s846_s20, 4  ;;  %s491_s27 = sshll.u32 %s1107_s3, 4  ;;  %s490_s29 = int_to_ptr.vmem [resolvable:$true] %s489_s29  ;;  %s492_s27 = int_to_ptr.hbm [resolvable:$true] %s491_s27 }
 0x195   : > { %611 = dma.vmem_to_hbm [thread:$0]  (%p628_p3), %s490_s29, 128, %s492_s27, [#allocation6]  }
 0x196   : > { %820 = dma.done.wait (%p628_p3), [#allocation6], 128  }
 0x197   : > { %822 = vsyncadd (%p628_p3), [#allocation6], 4294967168 }
 0x198 PF: > { %p17_p4 = scmp.ge.s32.totalorder %s907_s25, 4   ;;  %s1121_s12 = smov %s829_s13 }
 0x199   : > { %s1122_s13 = smov %s833_s14  ;;  %s1123_s14 = smov %s917_s28 }
 0x19a   : > { %s1124_s15 = smov %s907_s25  ;;  %19 = sbr.rel (!%p17_p4) target bundleno = 6 (0x6), region = 94 }
 0x19f   :  { %505 = vsyncpa [#allocation5], 1 }
 0x1a0   :  { %507 = vsyncpa [#allocation5 + $0x1], 1 }
 0x1a1   :  { %508 = vsyncpa [#allocation8], 1 }
 0x1a2   :  { %510 = vsyncpa [#allocation8 + $0x1], 1 }
 0x1a3   :  { %511 = vsyncpa [#allocation6], 1 }
 0x1a4   :  { %513 = vsyncpa [#allocation6 + $0x1], 1 }

</bundles_post_ra>
